<compile_context>
chip_gen: v7x
topology: tpu7x:2x2x1
jax: 0.10.0
libtpu: 0.0.40
codegen_flags: <defaults>
</compile_context>

<pallas_src>
import jax
import jax.numpy as jnp
from jax import lax
from jax.experimental import pallas as pl
from jax.experimental.pallas import tpu as pltpu

EPS = 1e-5
NEG_SLOPE = 0.2
HALO_W = 128                            # halo block width (one lane group)
VMEM_LIMIT_BYTES = 48 * 1024 * 1024     # <= ~48 MiB keeps v7x (64 MiB/TC) safe
TILE_VMEM_BUDGET = 20 * 1024 * 1024     # per-step footprint target for the picker


def _round_up(v, m):
    return ((v + m - 1) // m) * m


def _pick_l_tile(l_out, c_in, c_out, k, cd_bytes, out_bytes,
                 budget=TILE_VMEM_BUDGET):
    """Largest 128-multiple lane tile whose per-step VMEM footprint fits `budget`."""
    cap = _round_up(max(l_out, 1), 128)
    per_lane = (2 * 2 * c_in * cd_bytes      # two phase main blocks, double-buffered
                + 2 * c_in * cd_bytes        # extended-phase in-kernel temporaries
                + k * c_in * cd_bytes        # (K*C_in, TL) RHS scratch
                + 2 * c_out * out_bytes      # output tile, double-buffered (pass 2)
                + 2 * c_out * 4)             # f32 conv result + post-BN temporary
    fixed = (2 * 2 * c_in * HALO_W * cd_bytes   # two halo blocks, double-buffered
             + 2 * c_out * k * c_in * cd_bytes  # weight block
             + 256 * 1024)                      # misc headroom
    for cand in (4096, 2048, 1024, 512, 256, 128):
        if cand <= cap and fixed + cand * per_lane <= budget:
            return cand
    return 128


def _make_kernels(*, K, C_in, TL, L_out, t_axis):
    """Build the stats kernel and the fused conv+BN+act kernel for fixed tiling."""

    def conv_tile(xem, xeh, xom, xoh, w_ref, rhs_ref):
        # xem/xom: (1, C_in, TL) main phase tiles.
        # xeh/xoh: (1, C_in, HALO_W) = first lane-group of the NEXT tile of the
        #          same phase array (second BlockSpec on the same HBM buffer).
        ext_e = jnp.concatenate([xem[0, :, :], xeh[0, :, :]], axis=-1)
        ext_o = jnp.concatenate([xom[0, :, :], xoh[0, :, :]], axis=-1)
        # Build the (K*C_in, TL) RHS once (VMEM scratch); one MXU matmul with
        # contraction depth K*C_in replaces K accumulated dots.
        for k in range(K):
            src = ext_e if k % 2 == 0 else ext_o   # stride-2 -> phase = k % 2
            off = k // 2                           # static lane shift
            rhs_ref[k * C_in:(k + 1) * C_in, :] = src[:, off:off + TL]
        return jnp.dot(w_ref[...], rhs_ref[...],
                       preferred_element_type=jnp.float32)   # (C_out, TL) f32

    def stats_kernel(xem, xeh, xom, xoh, w_ref, st_ref, rhs_ref):
        acc = conv_tile(xem, xeh, xom, xoh, w_ref, rhs_ref)
        t = pl.program_id(t_axis)
        n_valid = L_out - t * TL                 # valid lanes of this tile
        lane = lax.broadcasted_iota(jnp.int32, acc.shape, 1)
        mask = lane < n_valid
        cnt = jnp.minimum(n_valid, TL).astype(jnp.float32)
        acc_m = jnp.where(mask, acc, 0.0)
        s = jnp.sum(acc_m, axis=-1, keepdims=True)            # (C_out, 1)
        mu = s / cnt
        d = jnp.where(mask, acc - mu, 0.0)
        m2 = jnp.sum(d * d, axis=-1, keepdims=True)            # (C_out, 1)
        st_ref[0, 0, :, 0:1] = s
        st_ref[0, 0, :, 1:2] = m2

    def bn_act_kernel(xem, xeh, xom, xoh, w_ref, scale_ref, shift_ref, o_ref,
                      rhs_ref):
        acc = conv_tile(xem, xeh, xom, xoh, w_ref, rhs_ref)
        z = acc * scale_ref[...] + shift_ref[...]               # folded BN (FMA)
        o_ref[0, :, :] = jnp.where(z >= 0.0, z, NEG_SLOPE * z).astype(o_ref.dtype)

    return stats_kernel, bn_act_kernel


def down_block(x, weight, bias, gamma, beta, *, kernel_size, stride=2,
               compute_dtype=jnp.bfloat16, out_dtype=jnp.float32, l_tile=None):
    """DownBlock forward: Conv1d(stride=2) -> BatchNorm1d(batch stats) -> LeakyReLU(0.2).

    x: (N, C_in, L), weight: (C_out, C_in, K). Returns (N, C_out, L_out) in out_dtype.
    `bias` is accepted for API parity but unused: train-mode BN subtracts the
    per-channel batch mean, which cancels the conv bias exactly.
    """
    # TODO(synk): BatchNorm running_mean/running_var buffer updates (a PyTorch
    # training-time side effect) are not produced; they do not affect this output.
    del bias
    if stride != 2:
        raise ValueError("DownBlock uses stride=2")
    N, C_in, L = x.shape
    C_out, _, K = weight.shape
    assert K == kernel_size
    if (K - 1) // 2 > HALO_W:
        raise ValueError("kernel_size too large for the 128-lane halo block")
    pad = (K - 1) // 2
    L_out = (L + 2 * pad - K) // stride + 1

    cd_bytes = jnp.dtype(compute_dtype).itemsize
    ob = jnp.dtype(out_dtype).itemsize
    if l_tile is None:
        TL = _pick_l_tile(L_out, C_in, C_out, K, cd_bytes, ob)
    else:
        TL = max(HALO_W, _round_up(l_tile, HALO_W))
    T = pl.cdiv(L_out, TL)

    # --- input prep: ONE pass over x (pad + even/odd phase split + cast) ------
    # Phase arrays are zero-padded to (T+1)*TL lanes so every main tile, every
    # halo block, and the last tile's halo index in-bounds (no ragged blocks).
    Lp = (T + 1) * TL
    xp_len = 2 * Lp
    xp = jnp.pad(x, ((0, 0), (0, 0), (pad, max(0, xp_len - L - pad))))
    xe = xp[:, :, 0::2].astype(compute_dtype)     # even phase (N, C_in, Lp)
    xo = xp[:, :, 1::2].astype(compute_dtype)     # odd  phase (N, C_in, Lp)
    # Tap-major flattened weight: w2d[co, k*C_in + c] = weight[co, c, k].
    w2d = jnp.transpose(weight, (0, 2, 1)).reshape(C_out, K * C_in)
    w2d = w2d.astype(compute_dtype)

    # --- grid: both axes parallel; the larger axis goes first so the megacore-
    #     sharded axis has extent > 1 even for small N (v7x). -------------------
    if T >= N:
        grid, t_axis = (T, N), 0
        def gmap(f):
            return lambda gt, gn: f(gn, gt)
    else:
        grid, t_axis = (N, T), 1
        def gmap(f):
            return lambda gn, gt: f(gn, gt)

    phase_main_spec = pl.BlockSpec((1, C_in, TL), gmap(lambda n, t: (n, 0, t)))
    phase_halo_spec = pl.BlockSpec(
        (1, C_in, HALO_W),
        gmap(lambda n, t: (n, 0, (t + 1) * (TL // HALO_W))))
    w_spec = pl.BlockSpec((C_out, K * C_in), gmap(lambda n, t: (0, 0)))
    vec_spec = pl.BlockSpec((C_out, 1), gmap(lambda n, t: (0, 0)))
    stats_spec = pl.BlockSpec((1, 1, C_out, 2), gmap(lambda n, t: (n, t, 0, 0)))
    out_spec = pl.BlockSpec((1, C_out, TL), gmap(lambda n, t: (n, 0, t)))

    stats_kernel, bn_act_kernel = _make_kernels(
        K=K, C_in=C_in, TL=TL, L_out=L_out, t_axis=t_axis)

    cparams = pltpu.CompilerParams(
        dimension_semantics=("parallel", "parallel"),
        vmem_limit_bytes=VMEM_LIMIT_BYTES)
    rhs_scratch = pltpu.VMEM((K * C_in, TL), compute_dtype)
    conv_flops = 2 * N * L_out * C_out * C_in * K
    phase_bytes = 2 * N * C_in * Lp * cd_bytes + C_out * K * C_in * cd_bytes

    # --- pass 1: per-tile BN partials (per-channel sum + centered M2) ---------
    # Note: partials are emitted per (n, t) tile (one tiny (C_out, 2) block per
    # step) and combined in the wrapper; this stays correct and portable whether
    # or not the t axis is megacore-sharded.
    stats = pl.pallas_call(
        stats_kernel,
        out_shape=jax.ShapeDtypeStruct((N, T, C_out, 2), jnp.float32),
        grid=grid,
        in_specs=[phase_main_spec, phase_halo_spec,
                  phase_main_spec, phase_halo_spec, w_spec],
        out_specs=stats_spec,
        scratch_shapes=[rhs_scratch],
        compiler_params=cparams,
        cost_estimate=pl.CostEstimate(
            flops=conv_flops + 6 * N * T * C_out * TL,
            transcendentals=0,
            bytes_accessed=phase_bytes + N * T * C_out * 2 * 4),
    )(xe, xe, xo, xo, w2d)

    # --- global train-mode BN stats: stable group (Chan) combination ----------
    s = stats[..., 0]                                    # (N, T, C_out) tile sums
    m2 = stats[..., 1]                                   # (N, T, C_out) tile M2
    cnt = jnp.clip(L_out - TL * jnp.arange(T, dtype=jnp.float32),
                   1.0, float(TL))                       # (T,) valid lanes / tile
    total = float(N * L_out)
    mean = jnp.sum(s, axis=(0, 1)) / total               # (C_out,)
    tile_mean = s / cnt[None, :, None]
    var = (jnp.sum(m2, axis=(0, 1))
           + jnp.sum(cnt[None, :, None] * (tile_mean - mean) ** 2, axis=(0, 1)))
    var = jnp.maximum(var / total, 0.0)                  # biased var (PyTorch BN)
    scale = gamma.astype(jnp.float32) * lax.rsqrt(var + EPS)
    shift = beta.astype(jnp.float32) - mean * scale

    # --- pass 2: recompute conv, fused scale/shift + LeakyReLU, lane-dense out -
    out = pl.pallas_call(
        bn_act_kernel,
        out_shape=jax.ShapeDtypeStruct((N, C_out, T * TL), out_dtype),
        grid=grid,
        in_specs=[phase_main_spec, phase_halo_spec,
                  phase_main_spec, phase_halo_spec, w_spec, vec_spec, vec_spec],
        out_specs=out_spec,
        scratch_shapes=[rhs_scratch],
        compiler_params=cparams,
        cost_estimate=pl.CostEstimate(
            flops=conv_flops + 4 * N * C_out * T * TL,
            transcendentals=0,
            bytes_accessed=phase_bytes + N * C_out * T * TL * ob),
    )(xe, xe, xo, xo, w2d, scale[:, None], shift[:, None])

    return out[:, :, :L_out] if T * TL != L_out else out


def down_block_reference(x, weight, bias, gamma, beta, *, kernel_size, stride=2):
    """Pure-JAX reference mirroring PyTorch forward semantics (training-mode BN)."""
    pad = (kernel_size - 1) // 2
    y = lax.conv_general_dilated(
        x, weight, window_strides=(stride,), padding=[(pad, pad)],
        dimension_numbers=("NCH", "OIH", "NCH"),
        precision=lax.Precision.HIGHEST)
    y = y + bias[None, :, None]
    mean = jnp.mean(y, axis=(0, 2), keepdims=True)
    var = jnp.mean((y - mean) ** 2, axis=(0, 2), keepdims=True)
    y_hat = (y - mean) * lax.rsqrt(var + EPS)
    y_hat = y_hat * gamma[None, :, None] + beta[None, :, None]
    return jnp.where(y_hat >= 0.0, y_hat, NEG_SLOPE * y_hat)


if __name__ == "__main__":
    # Small shapes consistent with DownBlock(C_in=4, C_out=8, kernel_size=3)
    N, C_in, C_out, L, K = 2, 4, 8, 16, 3

    key = jax.random.PRNGKey(0)
    kx, kw, kb, kg, kbt, kx2 = jax.random.split(key, 6)

    x = jax.random.normal(kx, (N, C_in, L), dtype=jnp.float32)
    weight = 0.1 * jax.random.normal(kw, (C_out, C_in, K), dtype=jnp.float32)
    bias = 0.1 * jax.random.normal(kb, (C_out,), dtype=jnp.float32)
    gamma = 1.0 + 0.1 * jax.random.normal(kg, (C_out,), dtype=jnp.float32)
    beta = 0.1 * jax.random.normal(kbt, (C_out,), dtype=jnp.float32)

    ref = jax.block_until_ready(
        down_block_reference(x, weight, bias, gamma, beta, kernel_size=K))

    # Strict-precision path (f32 MXU feed) for the tight numerical check.
    out_f32 = jax.block_until_ready(
        down_block(x, weight, bias, gamma, beta, kernel_size=K,
                   compute_dtype=jnp.float32))
    # Default fast path (bf16 MXU feed, per perf guidance for v6e/v7x).
    out_bf16 = jax.block_until_ready(
        down_block(x, weight, bias, gamma, beta, kernel_size=K,
                   compute_dtype=jnp.bfloat16))

    L_out = (L + 2 * ((K - 1) // 2) - K) // 2 + 1
    assert out_f32.shape == (N, C_out, L_out)
    assert out_bf16.shape == (N, C_out, L_out)
    err_f32 = float(jnp.max(jnp.abs(out_f32 - ref)))
    err_bf16 = float(jnp.max(jnp.abs(out_bf16 - ref)))
    assert jnp.allclose(out_f32, ref, atol=5e-4, rtol=5e-4), (
        f"f32 path max abs err {err_f32}")
    assert jnp.allclose(out_bf16, ref, atol=5e-2, rtol=5e-2), (
        f"bf16 path max abs err {err_bf16}")

    # Multi-tile path (T > 1, cross-tile halo, ragged-tail stat masking) at a
    # still-small shape by forcing a 128-lane tile.
    L2 = 600
    x2 = jax.random.normal(kx2, (N, C_in, L2), dtype=jnp.float32)
    ref2 = jax.block_until_ready(
        down_block_reference(x2, weight, bias, gamma, beta, kernel_size=K))
    out2 = jax.block_until_ready(
        down_block(x2, weight, bias, gamma, beta, kernel_size=K,
                   compute_dtype=jnp.float32, l_tile=128))
    err2 = float(jnp.max(jnp.abs(out2 - ref2)))
    assert out2.shape == ref2.shape
    assert jnp.allclose(out2, ref2, atol=5e-4, rtol=5e-4), (
        f"multi-tile path max abs err {err2}")

    print("KERNEL_OK")
</pallas_src>

<mosaic_0001>
module attributes {stable_mosaic.version = 11 : i64} {
  func.func @stats_kernel(%arg0: i32, %arg1: i32, %arg2: memref<1x4x128xf32, #tpu.memory_space<vmem>>, %arg3: memref<1x4x128xf32, #tpu.memory_space<vmem>>, %arg4: memref<1x4x128xf32, #tpu.memory_space<vmem>>, %arg5: memref<1x4x128xf32, #tpu.memory_space<vmem>>, %arg6: memref<8x12xf32, #tpu.memory_space<vmem>>, %arg7: memref<1x1x8x2xf32, #tpu.memory_space<vmem>>, %arg8: memref<12x128xf32, #tpu.memory_space<vmem>>) attributes {dimension_semantics = [#tpu.dimension_semantics<parallel>, #tpu.dimension_semantics<parallel>], iteration_bounds = array<i64: 2, 1>, scalar_prefetch = 0 : i64, scratch_operands = 1 : i64, tpu.core_type = #tpu.core_type<tc>, window_params = [{transform_indices = @transform_0, window_bounds = array<i64: 1, 4, 128>}, {transform_indices = @transform_1, window_bounds = array<i64: 1, 4, 128>}, {transform_indices = @transform_2, window_bounds = array<i64: 1, 4, 128>}, {transform_indices = @transform_3, window_bounds = array<i64: 1, 4, 128>}, {pipeline_mode = #tpu.pipeline_mode<synchronous>, transform_indices = @transform_4, window_bounds = array<i64: 8, 12>}, {transform_indices = @transform_5, window_bounds = array<i64: 1, 1, 8, 2>}]} {
    %c0 = arith.constant 0 : index
    %c0_0 = arith.constant 0 : index
    %c0_1 = arith.constant 0 : index
    %0 = vector.load %arg2[%c0, %c0_0, %c0_1] : memref<1x4x128xf32, #tpu.memory_space<vmem>>, vector<1x4x128xf32>
    %1 = vector.shape_cast %0 : vector<1x4x128xf32> to vector<4x128xf32>
    %c0_2 = arith.constant 0 : index
    %c0_3 = arith.constant 0 : index
    %c0_4 = arith.constant 0 : index
    %2 = vector.load %arg3[%c0_2, %c0_3, %c0_4] : memref<1x4x128xf32, #tpu.memory_space<vmem>>, vector<1x4x128xf32>
    %3 = vector.shape_cast %2 : vector<1x4x128xf32> to vector<4x128xf32>
    %4 = tpu.concatenate %1, %3 in 1 : vector<4x128xf32>, vector<4x128xf32> -> vector<4x256xf32>
    %c0_5 = arith.constant 0 : index
    %c0_6 = arith.constant 0 : index
    %c0_7 = arith.constant 0 : index
    %5 = vector.load %arg4[%c0_5, %c0_6, %c0_7] : memref<1x4x128xf32, #tpu.memory_space<vmem>>, vector<1x4x128xf32>
    %6 = vector.shape_cast %5 : vector<1x4x128xf32> to vector<4x128xf32>
    %c0_8 = arith.constant 0 : index
    %c0_9 = arith.constant 0 : index
    %c0_10 = arith.constant 0 : index
    %7 = vector.load %arg5[%c0_8, %c0_9, %c0_10] : memref<1x4x128xf32, #tpu.memory_space<vmem>>, vector<1x4x128xf32>
    %8 = vector.shape_cast %7 : vector<1x4x128xf32> to vector<4x128xf32>
    %9 = tpu.concatenate %6, %8 in 1 : vector<4x128xf32>, vector<4x128xf32> -> vector<4x256xf32>
    %10 = vector.extract_strided_slice %4 {offsets = [0, 0], sizes = [4, 128], strides = [1, 1]} : vector<4x256xf32> to vector<4x128xf32>
    %c0_11 = arith.constant 0 : index
    %c0_12 = arith.constant 0 : index
    %11 = vector.load %arg8[%c0_11, %c0_12] : memref<12x128xf32, #tpu.memory_space<vmem>>, vector<4x128xf32>
    tpu.vector_store %arg8[%c0_11, %c0_12], %10 {strides = array<i32>} : memref<12x128xf32, #tpu.memory_space<vmem>>, vector<4x128xf32>,
    %12 = vector.extract_strided_slice %9 {offsets = [0, 0], sizes = [4, 128], strides = [1, 1]} : vector<4x256xf32> to vector<4x128xf32>
    %c4 = arith.constant 4 : index
    %c0_13 = arith.constant 0 : index
    %13 = vector.load %arg8[%c4, %c0_13] : memref<12x128xf32, #tpu.memory_space<vmem>>, vector<4x128xf32>
    tpu.vector_store %arg8[%c4, %c0_13], %12 {strides = array<i32>} : memref<12x128xf32, #tpu.memory_space<vmem>>, vector<4x128xf32>,
    %14 = vector.extract_strided_slice %4 {offsets = [0, 1], sizes = [4, 128], strides = [1, 1]} : vector<4x256xf32> to vector<4x128xf32>
    %c8 = arith.constant 8 : index
    %c0_14 = arith.constant 0 : index
    %15 = vector.load %arg8[%c8, %c0_14] : memref<12x128xf32, #tpu.memory_space<vmem>>, vector<4x128xf32>
    tpu.vector_store %arg8[%c8, %c0_14], %14 {strides = array<i32>} : memref<12x128xf32, #tpu.memory_space<vmem>>, vector<4x128xf32>,
    %c0_15 = arith.constant 0 : index
    %c0_16 = arith.constant 0 : index
    %16 = vector.load %arg6[%c0_15, %c0_16] : memref<8x12xf32, #tpu.memory_space<vmem>>, vector<8x12xf32>
    %c0_17 = arith.constant 0 : index
    %c0_18 = arith.constant 0 : index
    %17 = vector.load %arg8[%c0_17, %c0_18] : memref<12x128xf32, #tpu.memory_space<vmem>>, vector<12x128xf32>
    %cst = arith.constant dense<0.000000e+00> : vector<8x128xf32>
    %18 = tpu.matmul %16, %17, %cst {dimension_numbers = #tpu.dot_dimension_numbers<[1], [0], [0], [1], [0, 0, 1, 1], [], []>} : vector<8x12xf32>, vector<12x128xf32>, vector<8x128xf32> -> vector<8x128xf32>
    %c128_i32 = arith.constant 128 : i32
    %19 = arith.muli %arg1, %c128_i32 : i32
    %c8_i32 = arith.constant 8 : i32
    %20 = arith.subi %c8_i32, %19 : i32
    %21 = tpu.iota {dimensions = array<i32: 1>} : vector<8x128xi32>
    %22 = vector.broadcast %20 : i32 to vector<8x128xi32>
    %23 = arith.cmpi slt, %21, %22 : vector<8x128xi32>
    %c128_i32_19 = arith.constant 128 : i32
    %24 = arith.minsi %20, %c128_i32_19 : i32
    %25 = arith.sitofp %24 : i32 to f32
    %cst_20 = arith.constant 0.000000e+00 : f32
    %26 = vector.broadcast %cst_20 : f32 to vector<8x128xf32>
    %27 = arith.select %23, %18, %26 : vector<8x128xi1>, vector<8x128xf32>
    %cst_21 = arith.constant dense<0.000000e+00> : vector<8xf32>
    %28 = vector.multi_reduction <add>, %27, %cst_21 [1] : vector<8x128xf32> to vector<8xf32>
    %29 = vector.shape_cast %28 : vector<8xf32> to vector<8x1xf32>
    %30 = vector.broadcast %25 : f32 to vector<8x1xf32>
    %31 = arith.divf %29, %30 : vector<8x1xf32>
    %32 = vector.broadcast %31 : vector<8x1xf32> to vector<8x128xf32>
    %33 = arith.subf %18, %32 : vector<8x128xf32>
    %cst_22 = arith.constant 0.000000e+00 : f32
    %34 = vector.broadcast %cst_22 : f32 to vector<8x128xf32>
    %35 = arith.select %23, %33, %34 : vector<8x128xi1>, vector<8x128xf32>
    %36 = arith.mulf %35, %35 : vector<8x128xf32>
    %cst_23 = arith.constant dense<0.000000e+00> : vector<8xf32>
    %37 = vector.multi_reduction <add>, %36, %cst_23 [1] : vector<8x128xf32> to vector<8xf32>
    %38 = vector.shape_cast %37 : vector<8xf32> to vector<8x1xf32>
    %c0_24 = arith.constant 0 : index
    %c0_25 = arith.constant 0 : index
    %c0_26 = arith.constant 0 : index
    %c0_27 = arith.constant 0 : index
    %39 = vector.load %arg7[%c0_24, %c0_25, %c0_26, %c0_27] : memref<1x1x8x2xf32, #tpu.memory_space<vmem>>, vector<1x1x8x1xf32>
    %40 = vector.shape_cast %39 : vector<1x1x8x1xf32> to vector<8x1xf32>
    %41 = vector.shape_cast %29 : vector<8x1xf32> to vector<1x1x8x1xf32>
    tpu.vector_store %arg7[%c0_24, %c0_25, %c0_26, %c0_27], %41 {strides = array<i32>} : memref<1x1x8x2xf32, #tpu.memory_space<vmem>>, vector<1x1x8x1xf32>,
    %c0_28 = arith.constant 0 : index
    %c0_29 = arith.constant 0 : index
    %c0_30 = arith.constant 0 : index
    %c1 = arith.constant 1 : index
    %42 = vector.load %arg7[%c0_28, %c0_29, %c0_30, %c1] : memref<1x1x8x2xf32, #tpu.memory_space<vmem>>, vector<1x1x8x1xf32>
    %43 = vector.shape_cast %42 : vector<1x1x8x1xf32> to vector<8x1xf32>
    %44 = vector.shape_cast %38 : vector<8x1xf32> to vector<1x1x8x1xf32>
    tpu.vector_store %arg7[%c0_28, %c0_29, %c0_30, %c1], %44 {strides = array<i32>} : memref<1x1x8x2xf32, #tpu.memory_space<vmem>>, vector<1x1x8x1xf32>,
    return
  }
  func.func @transform_0(%arg0: i32, %arg1: i32) -> (i32, i32, i32) {
    %c0_i32 = arith.constant 0 : i32
    %c0_i32_0 = arith.constant 0 : i32
    return %arg0, %c0_i32, %arg1 : i32, i32, i32
  }
  func.func @transform_1(%arg0: i32, %arg1: i32) -> (i32, i32, i32) {
    %c1_i32 = arith.constant 1 : i32
    %0 = arith.addi %arg1, %c1_i32 : i32
    %c1_i32_0 = arith.constant 1 : i32
    %1 = arith.muli %0, %c1_i32_0 : i32
    %c0_i32 = arith.constant 0 : i32
    %c0_i32_1 = arith.constant 0 : i32
    return %arg0, %c0_i32, %1 : i32, i32, i32
  }
  func.func @transform_2(%arg0: i32, %arg1: i32) -> (i32, i32, i32) {
    %c0_i32 = arith.constant 0 : i32
    %c0_i32_0 = arith.constant 0 : i32
    return %arg0, %c0_i32, %arg1 : i32, i32, i32
  }
  func.func @transform_3(%arg0: i32, %arg1: i32) -> (i32, i32, i32) {
    %c1_i32 = arith.constant 1 : i32
    %0 = arith.addi %arg1, %c1_i32 : i32
    %c1_i32_0 = arith.constant 1 : i32
    %1 = arith.muli %0, %c1_i32_0 : i32
    %c0_i32 = arith.constant 0 : i32
    %c0_i32_1 = arith.constant 0 : i32
    return %arg0, %c0_i32, %1 : i32, i32, i32
  }
  func.func @transform_4(%arg0: i32, %arg1: i32) -> (i32, i32) {
    %c0_i32 = arith.constant 0 : i32
    %c0_i32_0 = arith.constant 0 : i32
    %c0_i32_1 = arith.constant 0 : i32
    return %c0_i32, %c0_i32_0 : i32, i32
  }
  func.func @transform_5(%arg0: i32, %arg1: i32) -> (i32, i32, i32, i32) {
    %c0_i32 = arith.constant 0 : i32
    %c0_i32_0 = arith.constant 0 : i32
    %c0_i32_1 = arith.constant 0 : i32
    return %arg0, %arg1, %c0_i32, %c0_i32_0 : i32, i32, i32, i32
  }
}

</mosaic_0001>

<bundles_post_ra>
// kernel: tpu_custom_call.1
= control target key start
LH: loop header
LB: loop body
LE: loop exit
PB: predicated region body
PF: predicated region fallthrough
CT: control target
= control target key end

     0   :  { %s1240_s0 = inlined_call_operand.hbm [shape: f32[2,4,256], index: 0, kind: input, shape index: {}]   ;;  %s1241_s1 = inlined_call_operand.hbm [shape: f32[2,4,256], index: 1, kind: input, shape index: {}]   ;;  %s1242_s2 = inlined_call_operand.hbm [shape: f32[2,4,256], index: 2, kind: input, shape index: {}]   ;;  %s1243_s3 = inlined_call_operand.hbm [shape: f32[2,4,256], index: 3, kind: input, shape index: {}]   ;;  %s1244_s4 = inlined_call_operand.vmem [shape: f32[8,12], index: 4, kind: input, shape index: {}]   ;;  %s1245_s5 = inlined_call_operand.vmem [shape: f32[2,1,8,2], index: 5, kind: output, shape index: {}]  }
   0x1   :  { %1252 = sst [smem:[#allocation15_spill]] %s1241_s1 }
   0x2   :  { %10 = vsyncpa [#allocation4], 0 }
   0x3   :  { %12 = vsyncpa [#allocation4 + $0x1], 0 }
   0x4   :  { %13 = vsyncpa [#allocation6], 0 }
   0x5   :  { %15 = vsyncpa [#allocation6 + $0x1], 0 }
   0x6   :  { %16 = vsyncpa [#allocation9], 0 }
   0x7   :  { %18 = vsyncpa [#allocation9 + $0x1], 0  ;;  %s1010_s18 = smov 0   ;;  %s1012_s19 = smov 0  }
   0x8   :  { %s1014_s20 = smov 0   ;;  %s1016_s21 = smov 0  }
   0x9   :  { %s1018_s22 = smov 0   ;;  %s1020_s23 = smov 0  }
   0xa LB: > { %1253 = sst [smem:[#allocation13_spill]] %s965_s22  ;;  %s1247_s24 = sadd.s32 4294967295, %s969_s23   ;;  %s969_s23 = sphi %s1020_s23, %s24_s23   ;;  %s965_s22 = sphi %s1018_s22, %s1266_s22   ;;  %s961_s21 = sphi %s1016_s21, %s1265_s21   ;;  %s957_s20 = sphi %s1014_s20, %s1269_s20   ;;  %s953_s19 = sphi %s1012_s19, %s1268_s19   ;;  %s949_s18 = sphi %s1010_s18, %s1267_s18  }
   0xb   : > { %s36_s25 = sadd.s32 1, %s965_s22  ;;  %s45_s26 = sadd.s32 1, %s957_s20 }
   0xc   : > { %p38_p0 = scmp.ge.s32.totalorder %s36_s25, 2  ;;  %p52_p1 = scmp.ne.s32.totalorder %s957_s20, %s953_s19 }
   0xd   : > { %p53_p2 = scmp.eq.s32.totalorder %s969_s23, 0  ;;  %p58_p4 = scmp.ne.s32.totalorder %s953_s19, %s949_s18 }
   0xe   : > { %s1271_s25 = smov (%p38_p0, %s36_s25), 0  ;;  %p59_p5 = scmp.eq.s32.totalorder %s1247_s24, 0 }
   0xf   : > { %1254 = sst [smem:[#allocation14_spill]] %s1271_s25  ;;  %p54_p3 = por %p53_p2, %p52_p1 }
  0x10   : > { %s40_s27 = ssub.s32 %s965_s22, %s1271_s25  ;;  %p1051_p7 = por %p59_p5, %p58_p4 }
  0x11   : > { %p43_p6 = scmp.eq.s32.totalorder %s40_s27, 0  ;;  %p735_p8 = scmp.lt.s32.totalorder %s969_s23, 2 }
  0x12   : > { %s1255_s28 = scalar_select %p1051_p7, 1, 0 }
  0x13   : > { %s1057_s29 = scalar_select %p43_p6, %s957_s20, %s45_s26  }
  0x14   : > { %s1060_s30 = sand.u32 1, %s957_s20   ;;  %s1063_s6 = sshll.u32 %s965_s22, 7 }
  0x15   : > { %s1066_s7 = sshll.u32 %s1060_s30, 2  ;;  %p1068_p9 = pnand %p735_p8, %p54_p3 }
  0x16   : > { %s242_s9 = sand.u32 1, %s969_s23   ;;  %s1257_s1 = sld [smem:[#allocation15_spill]] }
  0x17   : > { %s1256_s8 = scalar_select %p1068_p9, 1, 0 }
  0x18   : > { %s246_s13 = scalar_lea.vmem [#allocation5], %s1066_s7  ;;  %s1082_s16 = scalar_lea.sflag [#allocation6], %s242_s9 }
  0x19   : > { %s256_s14 = sshll.u32 %s246_s13, 4  ;;  %p1087_p11 = pneg %p1068_p9  ;;  %s1080_s14 = int_to_ptr.vmem [resolvable:$true] %s256_s14 }
  0x1c   : > { %s559_s12 = scalar_lea.hbm %s1257_s1, %s1063_s6  ;;  %s794_s10 = scalar_lea.hbm %s1257_s1, 256 }
  0x1d   : > { %s1078_s15 = scalar_lea.hbm %s559_s12, 64  ;;  %s819_s17 = scalar_lea.hbm %s559_s12, 128 }
  0x1e   : > { %p790_p10 = scmp.ne.s32.totalorder %s1078_s15, %s819_s17  ;;  %p795_p0 = scmp.lt.u32.totalorder %s1078_s15, %s1257_s1 }
  0x1f   : > { %p796_p1 = scmp.lt.u32.totalorder %s794_s10, %s819_s17  ;;  %p798_p3 = scmp.lt.u32.totalorder %s819_s17, %s1078_s15 }
  0x20   : > { %p792_p12 = pnand %p1087_p11, %p790_p10 }
  0x21   : > { %p797_p2 = por %p796_p1, %p795_p0 }
  0x22   : > { %p793_p13 = pneg %p792_p12 }
  0x23   : > { %p799_p4 = por %p798_p3, %p797_p2 }
  0x25   : > { %p800_p5 = pnand %p799_p4, %p793_p13 }
  0x27   : > { %803 = shalt.err (!%p800_p5)
}
  0x28   : > { %s804_s9 = scalar_lea.vmem %s1080_s14, 64  ;;  %s971_s12 = smov [#allocation5]  }
  0x29   : > { %p805_p6 = scmp.ne.s32.totalorder %s1080_s14, %s804_s9  ;;  %s809_s26 = sshll.u32 %s971_s12, 4  ;;  %s810_s26 = int_to_ptr.vmem [resolvable:$false] %s809_s26 }
  0x2a   : > { %s811_s27 = scalar_lea.vmem %s810_s26, 128  ;;  %p812_p12 = scmp.lt.s32.totalorder %s1080_s14, %s810_s26 }
  0x2b   : > { %p807_p8 = pnand %p805_p6, %p1087_p11  ;;  %p813_p7 = scmp.lt.s32.totalorder %s811_s27, %s804_s9 }
  0x2d   : > { %p808_p10 = pneg %p807_p8  ;;  %p814_p0 = por %p813_p7, %p812_p12 }
  0x2f   : > { %p815_p1 = pnand %p814_p0, %p808_p10 }
  0x31   : > { %818 = shalt.err (!%p815_p1)
}
  0x32   : > { %728 = dma.hbm_to_vmem [thread:$0]  (!%p1068_p9), %s1078_s15, 64, %s1080_s14, %s1082_s16  }
  0x33   : > { %p687_p13 = scmp.ge.s32.totalorder %s969_s23, 1  ;;  %p302_p2 = scmp.lt.s32.totalorder %s969_s23, 3 }
  0x34   : > { %s1121_s13 = scalar_lea.hbm %s1240_s0, %s1063_s6  ;;  %s226_s9 = scalar_lea.vmem [#allocation3], %s1066_s7 }
  0x35   : > { %p1113_p3 = pnand %p687_p13, %p302_p2  ;;  %s235_s12 = sshll.u32 %s226_s9, 4  ;;  %s1124_s12 = int_to_ptr.vmem [resolvable:$true] %s235_s12 }
  0x36   : > { %s1130_s26 = scalar_lea.hbm %s1242_s2, %s1063_s6  ;;  %s223_s27 = scalar_lea.sflag [#allocation4], %s1060_s30 }
  0x37   : > { %s1259_s17 = scalar_select %p1113_p3, 1, 0 }
  0x38   : > { %s820_s24 = scalar_lea.hbm %s1121_s13, 64  ;;  %s825_s1 = scalar_lea.hbm %s1240_s0, 256 }
  0x39   : > { %p821_p7 = scmp.ne.s32.totalorder %s1121_s13, %s820_s24  ;;  %p826_p6 = scmp.lt.u32.totalorder %s1121_s13, %s1240_s0 }
  0x3a   : > { %p827_p8 = scmp.lt.u32.totalorder %s825_s1, %s820_s24  ;;  %p829_p12 = scmp.lt.u32.totalorder %s820_s24, %s1121_s13 }
  0x3b   : > { %p823_p4 = pnand %p821_p7, %p1087_p11 }
  0x3c   : > { %p828_p10 = por %p827_p8, %p826_p6 }
  0x3d   : > { %p824_p5 = pneg %p823_p4 }
  0x3e   : > { %p830_p0 = por %p829_p12, %p828_p10 }
  0x40   : > { %p831_p1 = pnand %p830_p0, %p824_p5 }
  0x42   : > { %834 = shalt.err (!%p831_p1)
}
  0x43   : > { %s835_s9 = scalar_lea.vmem %s1124_s12, 64  ;;  %s972_s14 = smov [#allocation3]  }
  0x44   : > { %p836_p13 = scmp.ne.s32.totalorder %s1124_s12, %s835_s9  ;;  %s840_s15 = sshll.u32 %s972_s14, 4  ;;  %s841_s15 = int_to_ptr.vmem [resolvable:$false] %s840_s15 }
  0x45   : > { %s842_s22 = scalar_lea.vmem %s841_s15, 128  ;;  %p843_p4 = scmp.lt.s32.totalorder %s1124_s12, %s841_s15 }
  0x46   : > { %p838_p2 = pnand %p836_p13, %p1087_p11  ;;  %p844_p3 = scmp.lt.s32.totalorder %s842_s22, %s835_s9 }
  0x48   : > { %p839_p7 = pneg %p838_p2  ;;  %p845_p6 = por %p844_p3, %p843_p4 }
  0x4a   : > { %p846_p8 = pnand %p845_p6, %p839_p7 }
  0x4c   : > { %849 = shalt.err (!%p846_p8)
}
  0x4d   : > { %725 = dma.hbm_to_vmem [thread:$0]  (!%p1068_p9), %s1121_s13, 64, %s1124_s12, %s223_s27  }
  0x4e   : > { %s267_s1 = scalar_lea.vmem [#allocation7], %s1066_s7  ;;  %s850_s25 = scalar_lea.hbm %s1130_s26, 64 }
  0x4f   : > { %s276_s24 = sshll.u32 %s267_s1, 4  ;;  %p851_p5 = scmp.ne.s32.totalorder %s1130_s26, %s850_s25  ;;  %s277_s24 = int_to_ptr.vmem [resolvable:$true] %s276_s24 }
  0x50   : > { %s855_s9 = scalar_lea.hbm %s1242_s2, 256  ;;  %p856_p12 = scmp.lt.u32.totalorder %s1130_s26, %s1242_s2 }
  0x51   : > { %p853_p3 = pnand %p851_p5, %p1087_p11  ;;  %p857_p0 = scmp.lt.u32.totalorder %s855_s9, %s850_s25 }
  0x52   : > { %p859_p13 = scmp.lt.u32.totalorder %s850_s25, %s1130_s26 }
  0x53   : > { %p854_p10 = pneg %p853_p3  ;;  %p858_p1 = por %p857_p0, %p856_p12 }
  0x55   : > { %p860_p2 = por %p859_p13, %p858_p1 }
  0x57   : > { %p861_p7 = pnand %p860_p2, %p854_p10 }
  0x59   : > { %864 = shalt.err (!%p861_p7)
}
  0x5a   : > { %s865_s13 = scalar_lea.vmem %s277_s24, 64  ;;  %s973_s12 = smov [#allocation7]  }
  0x5b   : > { %p866_p4 = scmp.ne.s32.totalorder %s277_s24, %s865_s13  ;;  %s870_s27 = sshll.u32 %s973_s12, 4  ;;  %s871_s27 = int_to_ptr.vmem [resolvable:$false] %s870_s27 }
  0x5c   : > { %s872_s22 = scalar_lea.vmem %s871_s27, 128  ;;  %p873_p5 = scmp.lt.s32.totalorder %s277_s24, %s871_s27 }
  0x5d   : > { %p868_p6 = pnand %p866_p4, %p1087_p11  ;;  %p874_p3 = scmp.lt.s32.totalorder %s872_s22, %s865_s13 }
  0x5f   : > { %p869_p8 = pneg %p868_p6  ;;  %p875_p9 = por %p874_p3, %p873_p5 }
  0x61   : > { %p876_p0 = pnand %p875_p9, %p869_p8 }
  0x63   : > { %879 = shalt.err (!%p876_p0)
}
  0x64   : > { %p1260_p12 = scmp.ne.s32.totalorder %s1256_s8, 0  ;;  %s574_s10 = scalar_lea.hbm %s1243_s3, %s1063_s6 }
  0x65   : > { %s287_s11 = scalar_lea.vmem [#allocation8], %s1066_s7  ;;  %s1178_s14 = scalar_lea.hbm %s574_s10, 64 }
  0x66   : > { %731 = dma.hbm_to_vmem [thread:$0]  (!%p1260_p12), %s1130_s26, 64, %s277_s24, %s1082_s16  }
  0x67   : > { %s297_s9 = sshll.u32 %s287_s11, 4  ;;  %s284_s15 = scalar_lea.sflag [#allocation9], %s1060_s30  ;;  %s298_s9 = int_to_ptr.vmem [resolvable:$true] %s297_s9 }
  0x68   : > { %s910_s13 = scalar_lea.hbm %s574_s10, 128  ;;  %s885_s26 = scalar_lea.hbm %s1243_s3, 256 }
  0x69   : > { %p881_p9 = scmp.ne.s32.totalorder %s1178_s14, %s910_s13  ;;  %p886_p13 = scmp.lt.u32.totalorder %s1178_s14, %s1243_s3 }
  0x6a   : > { %p887_p2 = scmp.lt.u32.totalorder %s885_s26, %s910_s13  ;;  %p889_p4 = scmp.lt.u32.totalorder %s910_s13, %s1178_s14 }
  0x6b   : > { %p883_p10 = pnand %p881_p9, %p1087_p11 }
  0x6c   : > { %p888_p7 = por %p887_p2, %p886_p13 }
  0x6d   : > { %p884_p1 = pneg %p883_p10 }
  0x6e   : > { %p890_p6 = por %p889_p4, %p888_p7 }
  0x70   : > { %p891_p8 = pnand %p890_p6, %p884_p1 }
  0x72   : > { %894 = shalt.err (!%p891_p8)
}
  0x73   : > { %s895_s30 = scalar_lea.vmem %s298_s9, 64  ;;  %s974_s7 = smov [#allocation8]  }
  0x74   : > { %p896_p5 = scmp.ne.s32.totalorder %s298_s9, %s895_s30  ;;  %s900_s27 = sshll.u32 %s974_s7, 4  ;;  %s901_s27 = int_to_ptr.vmem [resolvable:$false] %s900_s27 }
  0x75   : > { %s902_s22 = scalar_lea.vmem %s901_s27, 128  ;;  %p903_p9 = scmp.lt.s32.totalorder %s298_s9, %s901_s27 }
  0x76   : > { %p898_p3 = pnand %p896_p5, %p1087_p11  ;;  %p904_p10 = scmp.lt.s32.totalorder %s902_s22, %s895_s30 }
  0x78   : > { %p899_p0 = pneg %p898_p3  ;;  %p905_p12 = por %p904_p10, %p903_p9 }
  0x7a   : > { %p906_p2 = pnand %p905_p12, %p899_p0 }
  0x7c   : > { %909 = shalt.err (!%p906_p2)
}
  0x7d   : > { %p1261_p13 = scmp.ne.s32.totalorder %s1256_s8, 0  ;;  %p1262_p1 = scmp.ne.s32.totalorder %s1259_s17, 0 }
  0x7e   : > { %s308_s18 = sand.u32 (!%p1262_p1), 1, %s953_s19   ;;  %p1263_p11 = scmp.ne.s32.totalorder (!%p1262_p1), %s1255_s28, 0 }
  0x7f   : > { %734 = dma.hbm_to_vmem [thread:$0]  (!%p1261_p13), %s1178_s14, 64, %s298_s9, %s284_s15  }
  0x80   : > { %306 = sbr.rel (%p1262_p1) target bundleno = 782 (0x30e), region = 40  ;;  %s688_s1 = sshll.u32 (!%p1262_p1), %s308_s18, 2 }
  0x81   : > { %s309_s25 = scalar_lea.sflag (!%p1262_p1), [#allocation4], %s308_s18  ;;  %s312_s10 = scalar_lea.vmem (!%p1262_p1), [#allocation3], %s688_s1 }
  0x87   : > { %936 = dma.done.wait (%p1263_p11), %s309_s25, 64  }
  0x88   : > { %938 = vsyncadd (%p1263_p11), %s309_s25, 4294967232  ;;  %s1264_s11 = sadd.s32 4294967295, %s969_s23   ;;  %s321_s9 = scalar_lea.vmem [#allocation5], %s688_s1 }
  0x89   : > { %s317_s8 = sand.u32 1, %s1264_s11  }
  0x8a   : > { %s318_s13 = scalar_lea.sflag [#allocation6], %s317_s8 }
  0x8b   : > { %940 = dma.done.wait (%p1263_p11), %s318_s13, 128  }
  0x8c   : > { %942 = vsyncadd (%p1263_p11), %s318_s13, 4294967168  ;;  %s330_s17 = scalar_lea.vmem [#allocation7], %s688_s1  ;;  %s336_s14 = scalar_lea.sflag [#allocation9], %s308_s18 }
  0x8d   : > { %944 = dma.done.wait (%p1263_p11), %s336_s14, 64  }
  0x8e   : > { %946 = vsyncadd (%p1263_p11), %s336_s14, 4294967232  ;;  %v975_v0 = vmov 0.0|0.0   ;;  %v394_v1 = vld [vmem:[%s330_s17] sm:$0xf]  ;;  %v392_v2 = vld [vmem:[%s312_s10] sm:$0xf]  ;;  %v490_v12 = vlaneseq }
  0x8f   : > { %710 = vmatprep.subr.bf16.mxu0 %v975_v0  ;;  %396 = vst [vmem:[#allocation2 + $0x4] sm:$0xf] %v394_v1  ;;  %s976_s15 = smov 127   ;;  %395 = vst [vmem:[#allocation2] sm:$0xf] %v392_v2  ;;  %vm977_vm0 = vmmov 0  }
  0x90   : > { %399 = vrot.lane.b32.xlu0 %v392_v2, %s976_s15  ;;  %v393_v3 = vld [vmem:[%s321_s9] sm:$0xf]  ;;  %v978_v4 = vmov 0.0   ;;  %vm403_vm1 = vcmask 1039360   ;;  %vm414_vm2 = vcmask 1043456   ;;  %vm979_vm3 = vmmov 1  }
  0x91   : > { %707 = vmatprep.mubr.msk.f32.mxu0 %vm977_vm0, %v978_v4  ;;  %vm712_vm4 = vmpackc.low %vm414_vm2, %vm979_vm3  ;;  %v407_v11 = vld [vmem:[%s1244_s4] sm:$0xff]  ;;  %vm410_vm5 = vcmask 97280   ;;  %v491_v13 = vand.u32 127, %v490_v12  ;;  %p385_p12 = scmp.lt.s32.totalorder %s961_s21, 1  ;;  %vm508_vm7 = vcmask 7168   ;;  %vm510_vm8 = vcmask 15368  }
  0x93   : > { %vm493_vm6 = vcmp.lt.s32.totalorder %v491_v13, 8  ;;  %s1273_s21 = smov (!%p385_p12, %s961_s21), 1 }
  0x94   : > { %401 = vrot.lane.b32.xlu0 %v393_v3, %s976_s15  ;;  %s691_s16 = sshll.u32 %s1273_s21, 3 }
  0x95   : > { %s391_s6 = scalar_lea.vmem %s1245_s5, %s691_s16 }
  0x96   : > { %v408_v8 = vld [vmem:[#allocation2] sm:$0xff] }
 0x102   : > { %v400_v5 = vpop.permute.xlu0 %399 }
 0x106   : > { %v402_v6 = vpop.permute.xlu0 %401 }
 0x107   : > { %v404_v7 = vsel %vm403_vm1, %v400_v5, %v402_v6 }
 0x108   : > { %406 = vst [vmem:[#allocation2 + $0x8] sm:$0xf] %v404_v7 }
 0x10f   : > { %v409_v9 = vld [vmem:[#allocation2 + $0x8] sm:$0xf] }
 0x110   : > { %v711_v10 = vpack.c.bf16 %v409_v9, %v408_v8 }
 0x112   : > { %713 = vmatpush3.bf16.msk.msra.mxu0 %vm712_vm4, %v711_v10 }
 0x115   : > { %708 = vmatmul.mubr.msk.f32.vlgmr.msra.gmra.mrb[0].mxu0 %vm410_vm5, %v407_v11 }
 0x1e8   : > { %v484_v14 = vpop.f32.mrb[0].mxu0 }
 0x1e9   : > { %v709_v15 = vpop.f32.mrb[1].mxu0  ;;  %v497_v16 = vsel %vm493_vm6, %v484_v14, 0.0 }
 0x1ea   : > { %498 = vadd.xlane.f32.xlu1 %v497_v16 }
 0x277   : > { %v499_v17 = vpop.xlane.xlu1 %498 }
 0x278   : > { %v502_v18 = vmul.f32 0.125, %v499_v17  ;;  %509 = vst.msk [vmem:[%s391_s6] sm:$0xff] %vm508_vm7, %v499_v17 }
 0x27a   : > { %v503_v19 = vsub.f32 %v484_v14, %v502_v18 }
 0x27c   : > { %v504_v20 = vsel %vm493_vm6, %v503_v19, 0.0 }
 0x27d   : > { %v505_v21 = vmul.f32 %v504_v20, %v504_v20 }
 0x27f   : > { %506 = vadd.xlane.f32.xlu1 %v505_v21 }
 0x30c   : > { %v507_v22 = vpop.xlane.xlu1 %506 }
 0x30d   : > { %511 = vst.msk [vmem:[%s391_s6] sm:$0xff] %vm510_vm8, %v507_v22 }
 0x30e PF: > { %s24_s23 = sadd.s32 1, %s969_s23   ;;  %s1265_s21 = sld [smem:[#allocation13_spill]] }
 0x30f   : > { %p21_p7 = scmp.ge.s32.totalorder %s24_s23, 4   ;;  %s1266_s22 = sld [smem:[#allocation14_spill]] }
 0x310   : > { %s1267_s18 = smov %s953_s19  ;;  %s1268_s19 = smov %s957_s20 }
 0x311   : > { %s1269_s20 = smov %s1057_s29  ;;  %23 = sbr.rel (!%p21_p7) target bundleno = 10 (0xa), region = 117 }
 0x318   :  { %537 = vsyncpa [#allocation4], 1 }
 0x319   :  { %539 = vsyncpa [#allocation4 + $0x1], 1 }
 0x31a   :  { %540 = vsyncpa [#allocation6], 1 }
 0x31b   :  { %542 = vsyncpa [#allocation6 + $0x1], 1 }
 0x31c   :  { %543 = vsyncpa [#allocation9], 1 }
 0x31d   :  { %545 = vsyncpa [#allocation9 + $0x1], 1 }

</bundles_post_ra>
